<compile_context>
chip_gen: v7x
topology: tpu7x:2x2x1
jax: 0.10.0
libtpu: 0.0.40
codegen_flags: <defaults>
</compile_context>

<pallas_src>
import functools

import jax
import jax.numpy as jnp
from jax.experimental import pallas as pl
from jax.experimental.pallas import tpu as pltpu

IN_FEATURES = 256
OUT_FEATURES = 10
LANE = 128                      # lane-padded logit width (10 -> 128) for the MXU
_NEG = jnp.float32(-1e30)       # sentinel bias for padded logit lanes (f32-safe)


def _round_up(n, m):
    return ((n + m - 1) // m) * m


def _cdiv(a, b):
    return (a + b - 1) // b


def output_layer_kernel(x_ref, w_ref, b_ref, o_ref):
    # x_ref: (tile_b, 256)  w_ref: (256, 128)  b_ref: (1, 128)  o_ref: (tile_b, 10)
    logits = jnp.dot(x_ref[...], w_ref[...],
                     preferred_element_type=jnp.float32) + b_ref[...]
    # numerically-stable log_softmax over the 128 lanes: padded lanes hold
    # -1e30, so they never win the max and their exp underflows to exactly 0.
    m = jnp.max(logits, axis=-1, keepdims=True)
    shifted = logits - m
    lse = jnp.log(jnp.sum(jnp.exp(shifted), axis=-1, keepdims=True))
    # store only the 10 real class lanes (cheap masked store, 12.8x less HBM
    # writeback than the padded 128-lane output).
    o_ref[...] = (shifted - lse)[:, :OUT_FEATURES].astype(o_ref.dtype)


@functools.partial(jax.jit, static_argnames=("tb",))
def output_layer(x, w, b, *, tb=4096):
    """PyTorch OutputLayer forward: log_softmax(x @ w.T + b, axis=1).

    x: (B, 256) f32, w: (10, 256) f32 (PyTorch Linear layout), b: (10,) f32.
    Returns (B, 10) f32. `tb` is the target batch-tile size (rows per grid step).
    """
    B = x.shape[0]

    # --- lane-padded parameters (VMEM-resident across all grid steps) -------
    w_pad = jnp.zeros((IN_FEATURES, LANE), jnp.float32)
    w_pad = w_pad.at[:, :OUT_FEATURES].set(w.T.astype(jnp.float32))
    b_pad = jnp.full((1, LANE), _NEG, dtype=jnp.float32)
    b_pad = b_pad.at[0, :OUT_FEATURES].set(b.astype(jnp.float32))

    # --- batch tiling: derive tile from step count, no jnp.pad ---------------
    # >= 2 steps whenever possible so the "parallel" axis can use both v7x TCs;
    # tile is a multiple of 8 sublanes; ragged last block handled by Pallas
    # partial-block clipping (OOB reads are per-row garbage, OOB writes masked).
    min_steps = 2 if B > 8 else 1
    steps = max(_cdiv(B, max(tb, 8)), min_steps)
    tile_b = _round_up(_cdiv(B, steps), 8)
    steps = _cdiv(B, tile_b)

    cost = pl.CostEstimate(
        flops=2 * B * IN_FEATURES * LANE,
        transcendentals=B * (LANE + 1),
        bytes_accessed=(B * IN_FEATURES * 4           # x read
                        + B * OUT_FEATURES * 4        # out write (narrow)
                        + IN_FEATURES * LANE * 4      # w read
                        + LANE * 4),                  # b read
    )

    # double-buffered x + out tiles + resident params, with headroom; explicit
    # limit so large tiles don't trip v5e's 16 MiB scoped-VMEM default.
    vmem_need = (2 * tile_b * IN_FEATURES * 4     # x tiles (double-buffered)
                 + 2 * tile_b * LANE * 4          # out tiles (lane-padded layout)
                 + 2 * IN_FEATURES * LANE * 4     # w
                 + 8 * LANE * 4)                  # b + slack
    vmem_limit = min(max(int(vmem_need * 1.25), 4 << 20), 48 << 20)

    out = pl.pallas_call(
        output_layer_kernel,
        out_shape=jax.ShapeDtypeStruct((B, OUT_FEATURES), jnp.float32),
        grid=(steps,),
        in_specs=[
            pl.BlockSpec((tile_b, IN_FEATURES), lambda i: (i, 0)),   # x: streamed
            pl.BlockSpec((IN_FEATURES, LANE), lambda i: (0, 0)),     # w: resident
            pl.BlockSpec((1, LANE), lambda i: (0, 0)),               # b: resident
        ],
        out_specs=pl.BlockSpec((tile_b, OUT_FEATURES), lambda i: (i, 0)),
        compiler_params=pltpu.CompilerParams(
            dimension_semantics=("parallel",),
            vmem_limit_bytes=vmem_limit),
        cost_estimate=cost,
    )(x, w_pad, b_pad)

    return out


if __name__ == "__main__":
    key = jax.random.PRNGKey(0)
    k_x, k_w, k_b = jax.random.split(key, 3)

    # PyTorch Linear default init: U(-1/sqrt(fan_in), 1/sqrt(fan_in))
    bound = 1.0 / (IN_FEATURES ** 0.5)
    w = jax.random.uniform(k_w, (OUT_FEATURES, IN_FEATURES),
                           minval=-bound, maxval=bound, dtype=jnp.float32)
    b = jax.random.uniform(k_b, (OUT_FEATURES,),
                           minval=-bound, maxval=bound, dtype=jnp.float32)

    B = 8
    x = jax.random.normal(k_x, (B, IN_FEATURES), dtype=jnp.float32)
    out = output_layer(x, w, b)
    jax.block_until_ready(out)
    ref = jax.nn.log_softmax(x @ w.T + b, axis=1)
    assert out.shape == (B, OUT_FEATURES)
    assert jnp.allclose(out, ref, atol=1e-5, rtol=1e-5), "mismatch vs reference"

    # ragged batch: multiple grid steps + partial final block (clipped writeback)
    B2 = 37
    x2 = jax.random.normal(k_x, (B2, IN_FEATURES), dtype=jnp.float32)
    out2 = output_layer(x2, w, b, tb=16)
    jax.block_until_ready(out2)
    ref2 = jax.nn.log_softmax(x2 @ w.T + b, axis=1)
    assert out2.shape == (B2, OUT_FEATURES)
    assert jnp.allclose(out2, ref2, atol=1e-5, rtol=1e-5), "mismatch (ragged B)"

    print("KERNEL_OK")
</pallas_src>

<mosaic_0001>
module attributes {stable_mosaic.version = 11 : i64} {
  func.func @output_layer_kernel(%arg0: i32, %arg1: memref<8x256xf32, #tpu.memory_space<vmem>>, %arg2: memref<256x128xf32, #tpu.memory_space<vmem>>, %arg3: memref<1x128xf32, #tpu.memory_space<vmem>>, %arg4: memref<8x10xf32, #tpu.memory_space<vmem>>) attributes {dimension_semantics = [#tpu.dimension_semantics<parallel>], iteration_bounds = array<i64: 1>, scalar_prefetch = 0 : i64, scratch_operands = 0 : i64, tpu.core_type = #tpu.core_type<tc>, window_params = [{transform_indices = @transform_0, window_bounds = array<i64: 8, 256>}, {pipeline_mode = #tpu.pipeline_mode<synchronous>, transform_indices = @transform_1, window_bounds = array<i64: 256, 128>}, {pipeline_mode = #tpu.pipeline_mode<synchronous>, transform_indices = @transform_2, window_bounds = array<i64: 1, 128>}, {transform_indices = @transform_3, window_bounds = array<i64: 8, 10>}]} {
    %c0 = arith.constant 0 : index
    %c0_0 = arith.constant 0 : index
    %0 = vector.load %arg1[%c0, %c0_0] : memref<8x256xf32, #tpu.memory_space<vmem>>, vector<8x256xf32>
    %c0_1 = arith.constant 0 : index
    %c0_2 = arith.constant 0 : index
    %1 = vector.load %arg2[%c0_1, %c0_2] : memref<256x128xf32, #tpu.memory_space<vmem>>, vector<256x128xf32>
    %cst = arith.constant dense<0.000000e+00> : vector<8x128xf32>
    %2 = tpu.matmul %0, %1, %cst {dimension_numbers = #tpu.dot_dimension_numbers<[1], [0], [0], [1], [0, 0, 1, 1], [], []>} : vector<8x256xf32>, vector<256x128xf32>, vector<8x128xf32> -> vector<8x128xf32>
    %c0_3 = arith.constant 0 : index
    %c0_4 = arith.constant 0 : index
    %3 = vector.load %arg3[%c0_3, %c0_4] : memref<1x128xf32, #tpu.memory_space<vmem>>, vector<1x128xf32>
    %4 = vector.broadcast %3 : vector<1x128xf32> to vector<8x128xf32>
    %5 = arith.addf %2, %4 : vector<8x128xf32>
    %cst_5 = arith.constant dense<0xFF800000> : vector<8xf32>
    %6 = vector.multi_reduction <maximumf>, %5, %cst_5 [1] : vector<8x128xf32> to vector<8xf32>
    %7 = vector.shape_cast %6 : vector<8xf32> to vector<8x1xf32>
    %8 = vector.broadcast %7 : vector<8x1xf32> to vector<8x128xf32>
    %9 = arith.subf %5, %8 : vector<8x128xf32>
    %10 = math.exp %9 : vector<8x128xf32>
    %cst_6 = arith.constant dense<0.000000e+00> : vector<8xf32>
    %11 = vector.multi_reduction <add>, %10, %cst_6 [1] : vector<8x128xf32> to vector<8xf32>
    %12 = vector.shape_cast %11 : vector<8xf32> to vector<8x1xf32>
    %13 = math.log %12 : vector<8x1xf32>
    %14 = vector.broadcast %13 : vector<8x1xf32> to vector<8x128xf32>
    %15 = arith.subf %9, %14 : vector<8x128xf32>
    %16 = vector.extract_strided_slice %15 {offsets = [0, 0], sizes = [8, 10], strides = [1, 1]} : vector<8x128xf32> to vector<8x10xf32>
    %c0_7 = arith.constant 0 : index
    %c0_8 = arith.constant 0 : index
    %17 = vector.load %arg4[%c0_7, %c0_8] : memref<8x10xf32, #tpu.memory_space<vmem>>, vector<8x10xf32>
    tpu.vector_store %arg4[%c0_7, %c0_8], %16 {strides = array<i32>} : memref<8x10xf32, #tpu.memory_space<vmem>>, vector<8x10xf32>,
    return
  }
  func.func @transform_0(%arg0: i32) -> (i32, i32) {
    %c0_i32 = arith.constant 0 : i32
    %c0_i32_0 = arith.constant 0 : i32
    return %arg0, %c0_i32 : i32, i32
  }
  func.func @transform_1(%arg0: i32) -> (i32, i32) {
    %c0_i32 = arith.constant 0 : i32
    %c0_i32_0 = arith.constant 0 : i32
    %c0_i32_1 = arith.constant 0 : i32
    return %c0_i32, %c0_i32_0 : i32, i32
  }
  func.func @transform_2(%arg0: i32) -> (i32, i32) {
    %c0_i32 = arith.constant 0 : i32
    %c0_i32_0 = arith.constant 0 : i32
    %c0_i32_1 = arith.constant 0 : i32
    return %c0_i32, %c0_i32_0 : i32, i32
  }
  func.func @transform_3(%arg0: i32) -> (i32, i32) {
    %c0_i32 = arith.constant 0 : i32
    %c0_i32_0 = arith.constant 0 : i32
    return %arg0, %c0_i32 : i32, i32
  }
}

</mosaic_0001>

<bundles_post_ra>
// kernel: output_layer.1
= control target key start
LH: loop header
LB: loop body
LE: loop exit
PB: predicated region body
PF: predicated region fallthrough
CT: control target
= control target key end

     0   :  { %s387_s0 = inlined_call_operand.vmem [shape: f32[8,256], index: 0, kind: input, shape index: {}]   ;;  %s388_s1 = inlined_call_operand.vmem [shape: f32[256,128], index: 1, kind: input, shape index: {}]   ;;  %s389_s2 = inlined_call_operand.vmem [shape: f32[1,128], index: 2, kind: input, shape index: {}]   ;;  %s390_s3 = inlined_call_operand.hbm [shape: f32[8,10], index: 3, kind: output, shape index: {}]  }
   0x1   :  { %v33_v0 = vld [vmem:[%s388_s1 + $0x80] sm:$0xff]  ;;  %v34_v1 = vld [vmem:[%s388_s1 + $0x88] sm:$0xff]  ;;  %v35_v5 = vld [vmem:[%s388_s1 + $0x90] sm:$0xff] }
   0x2   :  { %v17_v2 = vld [vmem:[%s388_s1] sm:$0xff]  ;;  %v188_v3 = vpack.c.bf16 %v34_v1, %v33_v0  ;;  %v18_v4 = vld [vmem:[%s388_s1 + $0x8] sm:$0xff]  ;;  %v36_v6 = vld [vmem:[%s388_s1 + $0x98] sm:$0xff] }
   0x3   :  { %v190_v7 = vpack.c.bf16 %v18_v4, %v17_v2  ;;  %v192_v8 = vpack.c.bf16 %v36_v6, %v35_v5  ;;  %v19_v9 = vld [vmem:[%s388_s1 + $0x10] sm:$0xff]  ;;  %v20_v10 = vld [vmem:[%s388_s1 + $0x18] sm:$0xff]  ;;  %v37_v11 = vld [vmem:[%s388_s1 + $0xa0] sm:$0xff] }
   0x4   :  { %189 = vmatprep.subr.bf16.mxu0 %v188_v3  ;;  %v38_v12 = vld [vmem:[%s388_s1 + $0xa8] sm:$0xff]  ;;  %v194_v13 = vpack.c.bf16 %v20_v10, %v19_v9  ;;  %v21_v15 = vld [vmem:[%s388_s1 + $0x20] sm:$0xff]  ;;  %v39_v17 = vld [vmem:[%s388_s1 + $0xb0] sm:$0xff] }
   0x5   :  { %191 = vmatpush3.bf16.msra.mxu0 %v190_v7  ;;  %v196_v14 = vpack.c.bf16 %v38_v12, %v37_v11  ;;  %v22_v16 = vld [vmem:[%s388_s1 + $0x28] sm:$0xff]  ;;  %v40_v18 = vld [vmem:[%s388_s1 + $0xb8] sm:$0xff]  ;;  %v23_v21 = vld [vmem:[%s388_s1 + $0x30] sm:$0xff] }
   0x6   :  { %193 = vmatprep.subr.bf16.mxu0 %v192_v8  ;;  %v198_v19 = vpack.c.bf16 %v22_v16, %v21_v15  ;;  %v200_v20 = vpack.c.bf16 %v40_v18, %v39_v17  ;;  %v24_v22 = vld [vmem:[%s388_s1 + $0x38] sm:$0xff]  ;;  %v41_v23 = vld [vmem:[%s388_s1 + $0xc0] sm:$0xff]  ;;  %v42_v24 = vld [vmem:[%s388_s1 + $0xc8] sm:$0xff] }
   0x7   :  { %v16_v25 = vld [vmem:[%s387_s0 + $0x8] sm:$0xff] }
   0x8   :  { %120 = vmatprep.mubr.f32.mxu0 %v16_v25 }
   0x9   :  { %195 = vmatpush3.bf16.msra.mxu0 %v194_v13 }
   0xa   :  { %197 = vmatprep.subr.bf16.mxu0 %v196_v14 }
   0xb   :  { %8 = vsyncpa [#allocation3], 0  ;;  %v202_v26 = vpack.c.bf16 %v24_v22, %v23_v21  ;;  %v204_v27 = vpack.c.bf16 %v42_v24, %v41_v23  ;;  %v25_v28 = vld [vmem:[%s388_s1 + $0x40] sm:$0xff]  ;;  %v26_v29 = vld [vmem:[%s388_s1 + $0x48] sm:$0xff]  ;;  %vm136_vm0 = vcmask 80896  }
   0xc   :  { %v43_v30 = vld [vmem:[%s388_s1 + $0xd0] sm:$0xff]  ;;  %v44_v31 = vld [vmem:[%s388_s1 + $0xd8] sm:$0xff]  ;;  %v206_v32 = vpack.c.bf16 %v26_v29, %v25_v28  ;;  %v45_v36 = vld [vmem:[%s388_s1 + $0xe0] sm:$0xff] }
   0xd   :  { %199 = vmatpush3.bf16.msra.mxu0 %v198_v19  ;;  %v208_v33 = vpack.c.bf16 %v44_v31, %v43_v30  ;;  %v27_v34 = vld [vmem:[%s388_s1 + $0x50] sm:$0xff]  ;;  %v28_v35 = vld [vmem:[%s388_s1 + $0x58] sm:$0xff]  ;;  %v46_v37 = vld [vmem:[%s388_s1 + $0xe8] sm:$0xff] }
   0xe   :  { %201 = vmatprep.subr.bf16.mxu0 %v200_v20  ;;  %v210_v38 = vpack.c.bf16 %v28_v35, %v27_v34  ;;  %v212_v39 = vpack.c.bf16 %v46_v37, %v45_v36  ;;  %v29_v40 = vld [vmem:[%s388_s1 + $0x60] sm:$0xff]  ;;  %v30_v41 = vld [vmem:[%s388_s1 + $0x68] sm:$0xff]  ;;  %v47_v42 = vld [vmem:[%s388_s1 + $0xf0] sm:$0xff] }
   0xf   :  { %v48_v43 = vld [vmem:[%s388_s1 + $0xf8] sm:$0xff]  ;;  %v214_v44 = vpack.c.bf16 %v30_v41, %v29_v40  ;;  %v31_v46 = vld [vmem:[%s388_s1 + $0x70] sm:$0xff]  ;;  %v15_v49 = vld [vmem:[%s387_s0] sm:$0xff]  ;;  %s249_s0 = smov [#allocation2]  }
  0x10   :  { %v216_v45 = vpack.c.bf16 %v48_v43, %v47_v42  ;;  %v32_v47 = vld [vmem:[%s388_s1 + $0x78] sm:$0xff]  ;;  %v152_v52 = vld [vmem:[%s389_s2] ss:$0 sm:$0xff]  ;;  %s144_s1 = sshll.u32 %s249_s0, 4  ;;  %s145_s1 = int_to_ptr.vmem [resolvable:$true] %s144_s1 }
  0x11   :  { %203 = vmatpush3.bf16.msra.mxu0 %v202_v26  ;;  %v218_v48 = vpack.c.bf16 %v32_v47, %v31_v46  ;;  %s225_s2 = scalar_lea.vmem %s145_s1, 128  ;;  %p230_p1 = scmp.lt.s32.totalorder %s145_s1, %s145_s1 }
  0x12   :  { %205 = vmatprep.subr.bf16.mxu0 %v204_v27  ;;  %p226_p0 = scmp.ne.s32.totalorder %s145_s1, %s225_s2  ;;  %p231_p2 = scmp.lt.s32.totalorder %s225_s2, %s225_s2 }
  0x14   :  { %p232_p3 = por %p231_p2, %p230_p1 }
  0x15   :  { %207 = vmatpush3.bf16.msra.mxu0 %v206_v32 }
  0x16   :  { %209 = vmatprep.subr.bf16.mxu0 %v208_v33  ;;  %p233_p4 = pnand %p232_p3, %p226_p0 }
  0x19   :  { %211 = vmatpush3.bf16.msra.mxu0 %v210_v38 }
  0x1a   :  { %213 = vmatprep.subr.bf16.mxu0 %v212_v39 }
  0x1d   :  { %215 = vmatpush3.bf16.msra.mxu0 %v214_v44 }
  0x1e   :  { %217 = vmatprep.subr.bf16.mxu0 %v216_v45 }
  0x21   :  { %219 = vmatpush3.bf16.msra.mxu0 %v218_v48 }
  0x24   :  { %121 = vmatmul.mubr.f32.vlgmr.msra.gmra.mrb[0].mxu0 %v15_v49 }
  0xf7   :  { %v185_v50 = vpop.f32.mrb[0].mxu0 }
  0xf8   :  { %v186_v51 = vpop.f32.mrb[1].mxu0 }
  0xf9   :  { %v187_v53 = vadd.f32 %v186_v51, %v185_v50 }
  0xfb   :  { %v123_v54 = vadd.f32 %v187_v53, %v152_v52 }
  0xfd   :  { %126 = vmax.xlane.f32.xlu0 %v123_v54 }
 0x18a   :  { %v127_v55 = vpop.xlane.xlu0 %126 }
 0x18b   :  { %v128_v56 = vsub.f32 %v123_v54, %v127_v55 }
 0x18d   :  { %v129_v57 = vmul.f32 1.442695, %v128_v56 }
 0x18f   :  { %221 = vpow2.f32 %v129_v57 }
 0x199   :  { %v222_v58 = vpop.eup %221 }
 0x19a   :  { %131 = vadd.xlane.f32.xlu0 %v222_v58 }
 0x227   :  { %v132_v59 = vpop.xlane.xlu0 %131 }
 0x228   :  { %223 = vlog2.f32 %v132_v59 }
 0x232   :  { %v224_v60 = vpop.eup %223 }
 0x233   :  { %v134_v61 = vmul.f32 0.6931472, %v224_v60 }
 0x235   :  { %v135_v62 = vsub.f32 %v128_v56, %v134_v61 }
 0x237   :  { %137 = vst.msk [vmem:[#allocation2] sm:$0xff] %vm136_vm0, %v135_v62 }
 0x238   :  { %236 = shalt.err (!%p233_p4)
}
 0x239   :  { %s237_s30 = scalar_lea.hbm %s390_s3, 128 }
 0x23a   :  { %p238_p5 = scmp.ne.s32.totalorder %s390_s3, %s237_s30  ;;  %p241_p6 = scmp.lt.u32.totalorder %s237_s30, %s390_s3 }
 0x23c   :  { %p243_p7 = pnand %p241_p6, %p238_p5 }
 0x23e   :  { %246 = shalt.err (!%p243_p7)
}
 0x23f   :  { %147 = dma.vmem_to_hbm [thread:$0]  %s145_s1, 128, %s390_s3, [#allocation3]  }
 0x240   :  { %247 = dma.done.wait [#allocation3], 128  }
 0x241   :  { %248 = vsyncadd [#allocation3], 4294967168 }
 0x242   :  { %151 = vsyncpa [#allocation3], 1 }

</bundles_post_ra>
